<compile_context>
chip_gen: v7x
topology: tpu7x:2x2x1
jax: 0.10.0
libtpu: 0.0.40
codegen_flags: <defaults>
</compile_context>

<pallas_src>
import functools

import jax
import jax.numpy as jnp
from jax.experimental import pallas as pl
from jax.experimental.pallas import tpu as pltpu

_LANES = 128
_TR_MAX = 4096                 # rows/tile: 4096*128*4B = 2 MiB per f32 input buffer
_HALF_LOG_2PI = 0.9189385332046727
_MIN_KERNEL_ELEMS = 64 * 1024  # below this, plain XLA beats a pallas_call launch


def _softplus(x):
    # numerically-stable softplus(x) = max(x, 0) + log1p(exp(-|x|))
    return jnp.maximum(x, 0.0) + jnp.log1p(jnp.exp(-jnp.abs(x)))


def _default_num_cores():
    """2 on dual-TensorCore chips (v4 / v5p / v7x), else 1.  Errors on either side are
    correctness-neutral (the split is only a perf hint)."""
    try:
        dev = jax.devices()[0]
        if dev.platform != "tpu":
            return 1
        kind = str(getattr(dev, "device_kind", "")).lower().replace(" ", "")
        if "v4" in kind or "v5p" in kind or "v7" in kind:
            return 2
    except Exception:
        pass
    return 1


def _data_lp_kernel(params_ref, xs_ref, ys_ref, out_ref, *,
                    tr, tiles_per_core, rows, needs_mask):
    # params_ref: SMEM (2,) f32 = [theta_0, theta_1]   (scalar-prefetched)
    # xs_ref/ys_ref: VMEM (tr, 128) f32 tiles
    # out_ref: VMEM (1, 8, 128) f32 per-core accumulator, resident across the r axis
    c = pl.program_id(0)
    r = pl.program_id(1)

    @pl.when(r == 0)
    def _init():
        out_ref[...] = jnp.zeros_like(out_ref)

    theta0 = params_ref[0]
    theta1 = params_ref[1]

    x = xs_ref[...]
    y = ys_ref[...]

    logit = theta0 + x * theta1
    contrib = y * logit - _softplus(logit)          # Bernoulli(logits=logit).log_prob(y)

    if needs_mask:
        # Zero the rows past the true data extent (partial last tile / overshoot steps).
        t = c * tiles_per_core + r                  # logical (unclamped) tile index
        row0 = t * tr
        row_idx = jax.lax.broadcasted_iota(jnp.int32, contrib.shape, 0)
        contrib = jnp.where(row_idx < (rows - row0), contrib, 0.0)

    # Fold tr rows into one (8,128) vreg with pure full-vreg VPU adds (reshape is
    # (8,128)-tile aligned, so no XLU relayout); the single cross-lane reduce happens
    # once in the wrapper.
    out_ref[...] += contrib.reshape(-1, 8, _LANES).sum(axis=0)[None]


def _data_lp_partials(params, xs2d, ys2d, *, n_cores, tr_max=_TR_MAX):
    """Tiled kernel over a (rows, 128) f32 view; returns (n_cores, 8, 128) f32 partials."""
    rows = xs2d.shape[0]                            # always a multiple of 8 (see prepare)
    tr_max = max(8, (tr_max // 8) * 8)
    tr = min(tr_max, rows)
    tiles = pl.cdiv(rows, tr)
    if tiles < 2:
        n_cores = 1
    tiles_per_core = pl.cdiv(tiles, n_cores)
    overshoot = n_cores * tiles_per_core > tiles
    needs_mask = n_cores * tiles_per_core * tr != rows

    kernel = functools.partial(_data_lp_kernel, tr=tr, tiles_per_core=tiles_per_core,
                               rows=rows, needs_mask=needs_mask)

    def in_map(c, r, _params):
        t = c * tiles_per_core + r
        if overshoot:
            # Keep the DMA source in-bounds for overshoot steps; their contribution is
            # zeroed by the in-kernel row mask anyway.
            t = jnp.minimum(t, tiles - 1)
        return (t, 0)

    def out_map(c, r, _params):
        return (c, 0, 0)

    n_elems = rows * _LANES
    cost = pl.CostEstimate(
        flops=8 * n_elems,
        transcendentals=2 * n_elems,                # exp + log1p per element
        bytes_accessed=2 * n_elems * 4 + n_cores * 8 * _LANES * 4,
    )

    # TODO(synk): on v7x, verify via xprof that the leading "parallel" axis lands on both
    # TensorCores; if not, switch to pltpu.CORE_PARALLEL / pl.core_map for the split.
    return pl.pallas_call(
        kernel,
        out_shape=jax.ShapeDtypeStruct((n_cores, 8, _LANES), jnp.float32),
        grid_spec=pltpu.PrefetchScalarGridSpec(
            num_scalar_prefetch=1,
            grid=(n_cores, tiles_per_core),
            in_specs=[
                pl.BlockSpec((tr, _LANES), in_map),   # xs tile (f32)
                pl.BlockSpec((tr, _LANES), in_map),   # ys tile (f32)
            ],
            out_specs=pl.BlockSpec((1, 8, _LANES), out_map),
        ),
        compiler_params=pltpu.CompilerParams(
            dimension_semantics=("parallel", "arbitrary"),
        ),
        cost_estimate=cost,
    )(params, xs2d, ys2d)


def prepare_inputs(xs, ys):
    """One-time packing of (xs, ys); reuse across many theta evaluations (MCMC loops).

    Returns (xs2d, ys2d, tail_x, tail_y): the largest prefix whose length is a multiple of
    8*128 viewed as (rows, 128) for the kernel (a free reshape when N is already aligned),
    plus a <1024-element tail handled in plain JAX.  No zero-padding, no dtype narrowing.
    """
    xs_flat = jnp.ravel(xs).astype(jnp.float32)
    ys_flat = jnp.ravel(ys).astype(jnp.float32)     # no-op when ys is already f32
    n = xs_flat.shape[0]
    rows = (n // (_LANES * 8)) * 8
    n_bulk = rows * _LANES
    if rows > 0:
        xs2d = xs_flat[:n_bulk].reshape(rows, _LANES)
        ys2d = ys_flat[:n_bulk].reshape(rows, _LANES)
    else:
        xs2d = ys2d = None
    return xs2d, ys2d, xs_flat[n_bulk:], ys_flat[n_bulk:]


def log_joint_prepared(theta_0, theta_1, prior_mu, prior_sd, prepared, *,
                       use_kernel=True, tr_max=_TR_MAX, n_cores=None):
    """Log-joint from pre-packed data (cheap per-theta path for repeated evaluation)."""
    theta_0 = jnp.asarray(theta_0, jnp.float32)
    theta_1 = jnp.asarray(theta_1, jnp.float32)
    prior_mu = jnp.asarray(prior_mu, jnp.float32)
    prior_sd = jnp.asarray(prior_sd, jnp.float32)
    xs2d, ys2d, tail_x, tail_y = prepared

    data_lp = jnp.float32(0.0)
    if xs2d is not None:
        if use_kernel:
            if n_cores is None:
                n_cores = _default_num_cores()
            params = jnp.stack([theta_0, theta_1]).astype(jnp.float32)
            partials = _data_lp_partials(params, xs2d, ys2d,
                                         n_cores=n_cores, tr_max=tr_max)
            # Note: all contributions accumulate into one (8,128) f32 block per core, so
            # rounding error grows ~linearly in tile count; fine for a log-likelihood.
            data_lp = data_lp + jnp.sum(partials)
        else:
            logit = theta_0 + xs2d * theta_1
            data_lp = data_lp + jnp.sum(ys2d * logit - _softplus(logit))
    if tail_x.shape[0] > 0:                          # < 1024 leftover elements: plain JAX
        logit = theta_0 + tail_x * theta_1
        data_lp = data_lp + jnp.sum(tail_y * logit - _softplus(logit))

    def normal_lp(t):
        z = (t - prior_mu) / prior_sd
        return -0.5 * z * z - jnp.log(prior_sd) - _HALF_LOG_2PI

    return data_lp + normal_lp(theta_0) + normal_lp(theta_1)


def logistic_regression_log_joint(theta_0, theta_1, prior_mu, prior_sd, xs, ys, *,
                                  min_kernel_elems=_MIN_KERNEL_ELEMS,
                                  tr_max=_TR_MAX, n_cores=None):
    """Scalar log-joint: Normal priors on theta_0/theta_1 + Bernoulli(logits) data term."""
    prepared = prepare_inputs(xs, ys)
    n = int(jnp.size(xs))
    use_kernel = prepared[0] is not None and n >= min_kernel_elems
    return log_joint_prepared(theta_0, theta_1, prior_mu, prior_sd, prepared,
                              use_kernel=use_kernel, tr_max=tr_max, n_cores=n_cores)


def _reference_log_joint(theta_0, theta_1, prior_mu, prior_sd, xs, ys):
    logit = jnp.float32(theta_0) + xs.astype(jnp.float32) * jnp.float32(theta_1)
    data_lp = jnp.sum(ys.astype(jnp.float32) * logit - jax.nn.softplus(logit))

    def normal_lp(t):
        z = (t - prior_mu) / prior_sd
        return -0.5 * z * z - jnp.log(jnp.float32(prior_sd)) - _HALF_LOG_2PI

    return data_lp + normal_lp(jnp.float32(theta_0)) + normal_lp(jnp.float32(theta_1))


if __name__ == "__main__":
    key = jax.random.PRNGKey(0)
    kx, ky = jax.random.split(key)

    theta_0, theta_1, prior_mu, prior_sd = 0.5, -1.25, 0.0, 1.0

    def make_data(n, k1, k2):
        xs = jax.random.normal(k1, (n,), dtype=jnp.float32)
        ys = (jax.random.uniform(k2, (n,)) < 0.5).astype(jnp.float32)
        return xs, ys

    # 1) Aligned demo size: single (8,128) tile, forces the Pallas kernel path
    #    (the default min_kernel_elems would route this small N to plain XLA).
    xs, ys = make_data(1024, kx, ky)
    result = logistic_regression_log_joint(theta_0, theta_1, prior_mu, prior_sd, xs, ys,
                                           min_kernel_elems=0)
    result = jax.block_until_ready(result)
    ref = _reference_log_joint(theta_0, theta_1, prior_mu, prior_sd, xs, ys)
    assert jnp.allclose(result, ref, rtol=1e-5, atol=1e-3), (result, ref)

    # 2) Unaligned size: kernel on the 1024-element bulk + plain-JAX tail (896 elems).
    kx2, ky2 = jax.random.split(ky)
    xs2, ys2 = make_data(1920, kx2, ky2)
    r2 = logistic_regression_log_joint(theta_0, theta_1, prior_mu, prior_sd, xs2, ys2,
                                       min_kernel_elems=0)
    r2 = jax.block_until_ready(r2)
    ref2 = _reference_log_joint(theta_0, theta_1, prior_mu, prior_sd, xs2, ys2)
    assert jnp.allclose(r2, ref2, rtol=1e-5, atol=1e-3), (r2, ref2)

    # 3) Multi-tile / dual-core grid with an odd tile count: exercises the in-kernel row
    #    mask and the clamped overshoot step (runs serially but identically on 1-TC chips).
    kx3, ky3 = jax.random.split(kx2)
    xs3, ys3 = make_data(3072, kx3, ky3)
    r3 = logistic_regression_log_joint(theta_0, theta_1, prior_mu, prior_sd, xs3, ys3,
                                       min_kernel_elems=0, tr_max=8, n_cores=2)
    r3 = jax.block_until_ready(r3)
    ref3 = _reference_log_joint(theta_0, theta_1, prior_mu, prior_sd, xs3, ys3)
    assert jnp.allclose(r3, ref3, rtol=1e-5, atol=1e-3), (r3, ref3)

    # TODO(synk): Model.sample() (drawing theta_0/theta_1 from the prior) is RNG glue, not
    # a kernel hot path; use plain jax.random.normal if needed.
    print("KERNEL_OK")
</pallas_src>

<mosaic_0001>
module attributes {stable_mosaic.version = 11 : i64} {
  func.func @_data_lp_kernel(%arg0: i32, %arg1: i32, %arg2: memref<2xf32, #tpu.memory_space<smem>>, %arg3: memref<8x128xf32, #tpu.memory_space<vmem>>, %arg4: memref<8x128xf32, #tpu.memory_space<vmem>>, %arg5: memref<1x8x128xf32, #tpu.memory_space<vmem>>) attributes {dimension_semantics = [#tpu.dimension_semantics<parallel>, #tpu.dimension_semantics<arbitrary>], iteration_bounds = array<i64: 1, 1>, scalar_prefetch = 1 : i64, scratch_operands = 0 : i64, tpu.core_type = #tpu.core_type<tc>, window_params = [{transform_indices = @transform_0, window_bounds = array<i64: 8, 128>}, {transform_indices = @transform_1, window_bounds = array<i64: 8, 128>}, {transform_indices = @transform_2, window_bounds = array<i64: 1, 8, 128>}]} {
    %c0_i32 = arith.constant 0 : i32
    %0 = arith.cmpi eq, %arg1, %c0_i32 : i32
    %1 = arith.extui %0 : i1 to i32
    %c0_i32_0 = arith.constant 0 : i32
    %2 = arith.cmpi ne, %1, %c0_i32_0 : i32
    scf.if %2 {
      %cst_13 = arith.constant 0.000000e+00 : f32
      %27 = vector.broadcast %cst_13 : f32 to vector<1x8x128xf32>
      %c0_14 = arith.constant 0 : index
      %c0_15 = arith.constant 0 : index
      %c0_16 = arith.constant 0 : index
      %28 = vector.load %arg5[%c0_14, %c0_15, %c0_16] : memref<1x8x128xf32, #tpu.memory_space<vmem>>, vector<1x8x128xf32>
      tpu.vector_store %arg5[%c0_14, %c0_15, %c0_16], %27 {strides = array<i32>} : memref<1x8x128xf32, #tpu.memory_space<vmem>>, vector<1x8x128xf32>,
    } else {
    }
    %c0 = arith.constant 0 : index
    %3 = memref.load %arg2[%c0] : memref<2xf32, #tpu.memory_space<smem>>
    %c1 = arith.constant 1 : index
    %4 = memref.load %arg2[%c1] : memref<2xf32, #tpu.memory_space<smem>>
    %c0_1 = arith.constant 0 : index
    %c0_2 = arith.constant 0 : index
    %5 = vector.load %arg3[%c0_1, %c0_2] : memref<8x128xf32, #tpu.memory_space<vmem>>, vector<8x128xf32>
    %c0_3 = arith.constant 0 : index
    %c0_4 = arith.constant 0 : index
    %6 = vector.load %arg4[%c0_3, %c0_4] : memref<8x128xf32, #tpu.memory_space<vmem>>, vector<8x128xf32>
    %7 = vector.broadcast %4 : f32 to vector<8x128xf32>
    %8 = arith.mulf %5, %7 : vector<8x128xf32>
    %9 = vector.broadcast %3 : f32 to vector<8x128xf32>
    %10 = arith.addf %9, %8 : vector<8x128xf32>
    %11 = arith.mulf %6, %10 : vector<8x128xf32>
    %cst = arith.constant 0.000000e+00 : f32
    %12 = vector.broadcast %cst : f32 to vector<8x128xf32>
    %13 = arith.maximumf %10, %12 : vector<8x128xf32>
    %14 = math.absf %10 : vector<8x128xf32>
    %cst_5 = arith.constant 0.000000e+00 : f32
    %15 = vector.broadcast %cst_5 : f32 to vector<8x128xf32>
    %16 = arith.subf %15, %14 : vector<8x128xf32>
    %17 = math.exp %16 : vector<8x128xf32>
    %18 = math.log1p %17 : vector<8x128xf32>
    %19 = arith.addf %13, %18 : vector<8x128xf32>
    %20 = arith.subf %11, %19 : vector<8x128xf32>
    %c0_6 = arith.constant 0 : index
    %c0_7 = arith.constant 0 : index
    %c0_8 = arith.constant 0 : index
    %21 = vector.load %arg5[%c0_6, %c0_7, %c0_8] : memref<1x8x128xf32, #tpu.memory_space<vmem>>, vector<1x8x128xf32>
    %22 = vector.shape_cast %20 : vector<8x128xf32> to vector<1x8x128xf32>
    %cst_9 = arith.constant dense<0.000000e+00> : vector<8x128xf32>
    %23 = vector.multi_reduction <add>, %22, %cst_9 [0] : vector<1x8x128xf32> to vector<8x128xf32>
    %24 = vector.shape_cast %23 : vector<8x128xf32> to vector<1x8x128xf32>
    %25 = arith.addf %21, %24 : vector<1x8x128xf32>
    %c0_10 = arith.constant 0 : index
    %c0_11 = arith.constant 0 : index
    %c0_12 = arith.constant 0 : index
    %26 = vector.load %arg5[%c0_10, %c0_11, %c0_12] : memref<1x8x128xf32, #tpu.memory_space<vmem>>, vector<1x8x128xf32>
    tpu.vector_store %arg5[%c0_10, %c0_11, %c0_12], %25 {strides = array<i32>} : memref<1x8x128xf32, #tpu.memory_space<vmem>>, vector<1x8x128xf32>,
    return
  }
  func.func @transform_0(%arg0: i32, %arg1: i32, %arg2: memref<2xf32, #tpu.memory_space<smem>>) -> (i32, i32) {
    %c1_i32 = arith.constant 1 : i32
    %0 = arith.muli %arg0, %c1_i32 : i32
    %1 = arith.addi %0, %arg1 : i32
    %c0_i32 = arith.constant 0 : i32
    %c0_i32_0 = arith.constant 0 : i32
    return %1, %c0_i32 : i32, i32
  }
  func.func @transform_1(%arg0: i32, %arg1: i32, %arg2: memref<2xf32, #tpu.memory_space<smem>>) -> (i32, i32) {
    %c1_i32 = arith.constant 1 : i32
    %0 = arith.muli %arg0, %c1_i32 : i32
    %1 = arith.addi %0, %arg1 : i32
    %c0_i32 = arith.constant 0 : i32
    %c0_i32_0 = arith.constant 0 : i32
    return %1, %c0_i32 : i32, i32
  }
  func.func @transform_2(%arg0: i32, %arg1: i32, %arg2: memref<2xf32, #tpu.memory_space<smem>>) -> (i32, i32, i32) {
    %c0_i32 = arith.constant 0 : i32
    %c0_i32_0 = arith.constant 0 : i32
    %c0_i32_1 = arith.constant 0 : i32
    return %arg0, %c0_i32, %c0_i32_0 : i32, i32, i32
  }
}

</mosaic_0001>

<bundles_post_ra>
// kernel: tpu_custom_call.1
= control target key start
LH: loop header
LB: loop body
LE: loop exit
PB: predicated region body
PF: predicated region fallthrough
CT: control target
= control target key end

     0   :  { %s265_s0 = inlined_call_operand.hbm [shape: f32[2], index: 0, kind: input, shape index: {}]   ;;  %s266_s1 = inlined_call_operand.hbm [shape: f32[8,128], index: 1, kind: input, shape index: {}]   ;;  %s267_s2 = inlined_call_operand.hbm [shape: f32[8,128], index: 2, kind: input, shape index: {}]   ;;  %s268_s3 = inlined_call_operand.hbm [shape: f32[1,8,128], index: 3, kind: output, shape index: {}]  }
   0x1   :  { %s109_s14 = scalar_lea.hbm %s265_s0, 16 }
   0x2   :  { %p110_p0 = scmp.ne.s32.totalorder %s265_s0, %s109_s14  ;;  %p113_p1 = scmp.lt.u32.totalorder %s109_s14, %s265_s0 }
   0x4   :  { %p115_p2 = pnand %p113_p1, %p110_p0 }
   0x6   :  { %118 = shalt.err (!%p115_p2)  }
   0x7   :  { %s193_s19 = smov [#allocation3]  }
   0x8   :  { %9 = dma.hbm_to_smem %s265_s0, 16, %s193_s19, [#allocation2] }
   0x9   :  { %185 = dma.done.wait [#allocation2], 16 }
   0xa   :  { %186 = vsyncadd [#allocation2], 4294967280 }
   0xb   :  { %11 = sfence }
   0xc   :  { %12 = vsyncpa [#allocation5], 0 }
   0xd   :  { %13 = vsyncpa [#allocation8], 0 }
   0xe   :  { %14 = vsyncpa [#allocation6], 0  ;;  %s194_s22 = smov [#allocation4]   ;;  %s195_s24 = smov [#allocation7]  }
   0xf   :  { %s24_s23 = sshll.u32 %s194_s22, 4  ;;  %s37_s25 = sshll.u32 %s195_s24, 4  ;;  %s25_s23 = int_to_ptr.vmem [resolvable:$true] %s24_s23  ;;  %s38_s25 = int_to_ptr.vmem [resolvable:$true] %s37_s25 }
  0x10   :  { %s119_s28 = scalar_lea.hbm %s266_s1, 128 }
  0x11   :  { %p120_p3 = scmp.ne.s32.totalorder %s266_s1, %s119_s28  ;;  %p123_p4 = scmp.lt.u32.totalorder %s119_s28, %s266_s1 }
  0x13   :  { %p125_p5 = pnand %p123_p4, %p120_p3 }
  0x15   :  { %128 = shalt.err (!%p125_p5)
}
  0x16   :  { %s129_s5 = scalar_lea.vmem %s25_s23, 128  ;;  %p134_p7 = scmp.lt.s32.totalorder %s25_s23, %s25_s23 }
  0x17   :  { %p130_p6 = scmp.ne.s32.totalorder %s25_s23, %s129_s5  ;;  %p135_p8 = scmp.lt.s32.totalorder %s129_s5, %s129_s5 }
  0x19   :  { %p136_p9 = por %p135_p8, %p134_p7 }
  0x1b   :  { %p137_p10 = pnand %p136_p9, %p130_p6 }
  0x1d   :  { %140 = shalt.err (!%p137_p10)
}
  0x1e   :  { %27 = dma.hbm_to_vmem [thread:$0]  %s266_s1, 128, %s25_s23, [#allocation5]  }
  0x1f   :  { %s141_s10 = scalar_lea.hbm %s267_s2, 128 }
  0x20   :  { %p142_p11 = scmp.ne.s32.totalorder %s267_s2, %s141_s10  ;;  %p145_p12 = scmp.lt.u32.totalorder %s141_s10, %s267_s2 }
  0x22   :  { %p147_p13 = pnand %p145_p12, %p142_p11 }
  0x24   :  { %150 = shalt.err (!%p147_p13)
}
  0x25   :  { %s151_s15 = scalar_lea.vmem %s38_s25, 128  ;;  %p156_p1 = scmp.lt.s32.totalorder %s38_s25, %s38_s25 }
  0x26   :  { %p152_p0 = scmp.ne.s32.totalorder %s38_s25, %s151_s15  ;;  %p157_p2 = scmp.lt.s32.totalorder %s151_s15, %s151_s15 }
  0x28   :  { %p158_p3 = por %p157_p2, %p156_p1 }
  0x2a   :  { %p159_p4 = pnand %p158_p3, %p152_p0 }
  0x2c   :  { %162 = shalt.err (!%p159_p4)
}
  0x2d   :  { %40 = dma.hbm_to_vmem [thread:$0]  %s267_s2, 128, %s38_s25, [#allocation8]  }
  0x2e   :  { %187 = dma.done.wait [#allocation5], 128  }
  0x2f   :  { %188 = vsyncadd [#allocation5], 4294967168 }
  0x30   :  { %189 = dma.done.wait [#allocation8], 128  }
  0x31   :  { %190 = vsyncadd [#allocation8], 4294967168  ;;  %s99_s17 = sld [smem:[#allocation3 + $0x1]]  ;;  %s54_s18 = sld [smem:[#allocation3]]  ;;  %v56_v0 = vld [vmem:[#allocation4] sm:$0xff]  ;;  %v57_v13 = vld [vmem:[#allocation7] sm:$0xff] }
  0x32   :  { %s196_s2 = smov [#allocation9]  }
  0x33   :  { %s89_s19 = sshll.u32 %s196_s2, 4  ;;  %s90_s19 = int_to_ptr.vmem [resolvable:$true] %s89_s19 }
  0x34   :  { %s163_s20 = scalar_lea.vmem %s90_s19, 128  ;;  %p168_p6 = scmp.lt.s32.totalorder %s90_s19, %s90_s19 }
  0x35   :  { %p164_p5 = scmp.ne.s32.totalorder %s90_s19, %s163_s20  ;;  %p169_p7 = scmp.lt.s32.totalorder %s163_s20, %s163_s20 }
  0x37   :  { %v58_v1 = vstv %s99_s17  ;;  %v60_v2 = vstv %s54_s18  ;;  %p170_p8 = por %p169_p7, %p168_p6 }
  0x38   :  { %v59_v3 = vmul.f32 %v58_v1, %v56_v0 }
  0x39   :  { %p171_p9 = pnand %p170_p8, %p164_p5 }
  0x3a   :  { %v61_v4 = vadd.f32 %v60_v2, %v59_v3 }
  0x3c   :  { %v64_v5 = vand.u32 2147483647, %v61_v4  ;;  %v63_v16 = vmax.f32 %v61_v4, 0.0  ;;  %v62_v18 = vmul.f32 %v61_v4, %v57_v13 }
  0x3e   :  { %v65_v6 = vsub.f32 0.0, %v64_v5 }
  0x40   :  { %v66_v7 = vmul.f32 1.442695, %v65_v6 }
  0x42   :  { %105 = vpow2.f32 %v66_v7 }
  0x4c   :  { %v106_v8 = vpop.eup %105 }
  0x4d   :  { %v68_v9 = vadd.f32 1.0, %v106_v8  ;;  %v71_v10 = vmul.f32 -0.5, %v106_v8  ;;  %v74_v12 = vand.u32 2147483647, %v106_v8 }
  0x4f   :  { %107 = vlog2.f32 %v68_v9  ;;  %v72_v11 = vadd.f32 1.0, %v71_v10  ;;  %vm75_vm0 = vcmp.lt.f32.partialorder %v74_v12, 0.0004427343 }
  0x51   :  { %v73_v14 = vmul.f32 %v106_v8, %v72_v11 }
  0x59   :  { %v108_v15 = vpop.eup %107 }
  0x5a   :  { %v70_v17 = vmul.f32 0.6931472, %v108_v15 }
  0x5c   :  { %v76_v19 = vsel %vm75_vm0, %v73_v14, %v70_v17 }
  0x5d   :  { %v77_v20 = vadd.f32 %v76_v19, %v63_v16 }
  0x5f   :  { %v78_v21 = vsub.f32 %v62_v18, %v77_v20 }
  0x61   :  { %82 = vst [vmem:[#allocation9] sm:$0xff] %v78_v21 }
  0x62   :  { %174 = shalt.err (!%p171_p9)
}
  0x63   :  { %s175_s23 = scalar_lea.hbm %s268_s3, 128 }
  0x64   :  { %p176_p10 = scmp.ne.s32.totalorder %s268_s3, %s175_s23  ;;  %p179_p11 = scmp.lt.u32.totalorder %s175_s23, %s268_s3 }
  0x66   :  { %p181_p12 = pnand %p179_p11, %p176_p10 }
  0x68   :  { %184 = shalt.err (!%p181_p12)
}
  0x69   :  { %92 = dma.vmem_to_hbm [thread:$0]  %s90_s19, 128, %s268_s3, [#allocation6]  }
  0x6a   :  { %191 = dma.done.wait [#allocation6], 128  }
  0x6b   :  { %192 = vsyncadd [#allocation6], 4294967168 }
  0x6c   :  { %96 = vsyncpa [#allocation5], 1 }
  0x6d   :  { %97 = vsyncpa [#allocation8], 1 }
  0x6e   :  { %98 = vsyncpa [#allocation6], 1 }

</bundles_post_ra>
